<compile_context>
chip_gen: v6e
topology: v6e:2x2x1
jax: 0.10.0
libtpu: 0.0.40
codegen_flags: <defaults>
</compile_context>

<pallas_src>
import functools
import numpy as np

import jax
import jax.numpy as jnp
from jax.experimental import pallas as pl
from jax.experimental.pallas import tpu as pltpu

NEG_SLOPE = 0.2                          # LeakyReLU slope in the Encoder blocks


# ----------------------------------------------------------------------------
# VMEM planning.
# ----------------------------------------------------------------------------
def _round_up(x, m):
    return -(-x // m) * m


def _vmem_plan():
    """Per-generation (vmem_limit_bytes, per-call VMEM budget, default target M)."""
    kind = ""
    try:
        kind = jax.devices()[0].device_kind.lower()
    except Exception:
        pass
    if "v5" in kind or "v6" in kind:
        # 128 MiB physical VMEM, single TensorCore: large tiles, few grid steps.
        return 96 * 2 ** 20, 64 * 2 ** 20, 2048
    # v7x (64 MiB physical / 32 MiB scoped per core) and unknown chips.
    return 32 * 2 ** 20, 22 * 2 ** 20, 1024


def _conv_vmem_bytes(th, *, hp, wsplit, cin, cout, wo, stride, resident,
                     tap_dots):
    """Rough per-pallas_call VMEM footprint: double-buffered pipeline buffers
    plus in-kernel temporaries, including (sublane, lane) tile padding."""
    s = stride
    m = th * wo
    lane_in = _round_up(s * cin, 128)
    sub_in = _round_up(wsplit, 16)                       # bf16: 16 sublanes/tile
    rows = hp if resident else (s * th + 2)
    b_in = 2 * rows * sub_in * lane_in * 2               # input (2 buffers)
    b_w = 2 * _round_up(9 * cin, 16) * _round_up(cout, 128) * 2
    b_out = 2 * _round_up(m, 16) * _round_up(cout, 128) * 2   # out / fc-w tile
    b_tmp = m * _round_up(cout, 128) * 4                 # f32 accumulator
    if tap_dots:
        b_tmp += 3 * m * _round_up(cin, 128) * 2         # per-tap staging
    else:
        b_tmp += 2 * m * _round_up(9 * cin, 128) * 2     # patch slab + staging
    return b_in + b_w + b_out + b_tmp


def _choose_row_tile(*, n, ho, wo, hp, wsplit, cin, cout, stride, tap_dots,
                     target_m, budget):
    """Pick (output-row tile height th, resident-input?) under a VMEM budget.

    Prefers keeping the whole padded sample resident in VMEM (no HBM row
    gather at all); falls back to per-tile minimal-halo row windows otherwise.
    Keeps the matmul M = th*wo near target_m, and >= 2 total parallel grid
    steps when batch == 1 so both v7x TensorCores get work.
    """
    cands = [t for t in range(1, ho + 1) if ho % t == 0 and (t * wo) % 8 == 0]
    if not cands:
        cands = [ho]

    def total(t, resident):
        return _conv_vmem_bytes(t, hp=hp, wsplit=wsplit, cin=cin, cout=cout,
                                wo=wo, stride=stride, resident=resident,
                                tap_dots=tap_dots)

    for resident in (True, False):
        ok = [t for t in cands if total(t, resident) <= budget]
        if not ok:
            continue
        pref = [t for t in ok if t * wo <= target_m] or [min(ok)]
        if n < 2:
            pref = [t for t in pref if ho // t >= 2] or pref
        return max(pref), resident
    # Over budget either way: smallest non-resident tile, let vmem_limit check.
    return min(cands), False


# ----------------------------------------------------------------------------
# Conv tile compute (shared by the plain and the fc-fused kernels).
# ----------------------------------------------------------------------------
def _conv_tile_acc(x_ref, w_ref, b_ref, *, stride, th, wo, cin, cout,
                   resident, tap_dots, negative_slope):
    """Returns the (th*wo, cout) f32 activations (bias + LeakyReLU applied).

    x_ref : resident -> (Hp, Wsplit, s*cin) padded sample, slice the tile's
            halo window in-kernel; else -> (s*th+2, Wsplit, s*cin) window.
    w_ref : (9*cin, cout) bf16, rows ordered (kh*3+kw)*cin + ci.
    b_ref : (1, cout) f32.
    """
    s = stride
    hwin = s * th + 2
    if resident:
        row0 = pl.program_id(1) * (s * th)
        win = x_ref[pl.ds(row0, hwin)]                   # (hwin, Wsplit, s*cin)
    else:
        win = x_ref[...]

    if s == 1:
        rows = [win[kh:kh + th] for kh in range(3)]
    else:                        # s == 2: pair-fold the height stride (free)
        win2 = win.reshape(th + 1, 2, win.shape[1], win.shape[2])
        rows = [win2[0:th, 0], win2[0:th, 1], win2[1:th + 1, 0]]

    def tap(kh, kw):
        qw, pw = kw // s, kw % s
        return rows[kh][:, qw:qw + wo, pw * cin:(pw + 1) * cin]   # (th, wo, cin)

    if tap_dots:
        # 9 accumulated MXU dots: same MXU passes as one K=9*cin dot for
        # cin >= 128, but no (M, 9*cin) patch slab in VMEM/vregs.
        acc = jnp.zeros((th * wo, cout), jnp.float32)
        for kh in range(3):
            for kw in range(3):
                ridx = (kh * 3 + kw) * cin
                acc = acc + jnp.dot(tap(kh, kw).reshape(th * wo, cin),
                                    w_ref[ridx:ridx + cin, :],
                                    preferred_element_type=jnp.float32)
    else:
        patches = jnp.concatenate([tap(kh, kw) for kh in range(3)
                                   for kw in range(3)], axis=-1)
        acc = jnp.dot(patches.reshape(th * wo, 9 * cin), w_ref[...],
                      preferred_element_type=jnp.float32)

    acc = acc + b_ref[...]                               # (M, cout) + (1, cout)
    return jnp.where(acc >= 0.0, acc, negative_slope * acc)


def _conv_kernel(x_ref, w_ref, b_ref, o_ref, **kw):
    acc = _conv_tile_acc(x_ref, w_ref, b_ref, **kw)
    o_ref[...] = acc.astype(o_ref.dtype)


def _conv_fc_kernel(x_ref, w_ref, b_ref, fcw_ref, fcb_ref, o_ref, **kw):
    acc = _conv_tile_acc(x_ref, w_ref, b_ref, **kw)
    # Match the bf16 rounding the activations would have had if materialised.
    acc = acc.astype(jnp.bfloat16).astype(jnp.float32)
    part = jnp.sum(acc * fcw_ref[...].astype(jnp.float32))

    @pl.when(pl.program_id(1) == 0)
    def _():
        o_ref[...] = fcb_ref[...]

    o_ref[...] += part


# ----------------------------------------------------------------------------
# Layer wrapper: one pallas_call per conv layer (optionally with the fc fused).
# ----------------------------------------------------------------------------
def _conv_layer(x_nhwc, w, b, *, stride, fc_w=None, fc_b=None,
                negative_slope=NEG_SLOPE, target_m=None):
    n, h, wi, cin = x_nhwc.shape
    k2, cout = w.shape
    assert k2 == 9 * cin, (w.shape, cin)
    s = stride
    assert s in (1, 2), s
    assert h % s == 0 and wi % s == 0, (
        "spatial dims must be divisible by the stride", h, wi, s)
    ho, wo = h // s, wi // s
    hp, wp = h + 2, wi + 2
    assert wp % s == 0
    wsplit = wp // s
    lanes = s * cin
    fuse = fc_w is not None

    limit_bytes, budget, default_m = _vmem_plan()
    if target_m is None:
        target_m = default_m
    tap_dots = cin >= 128

    th, resident = _choose_row_tile(
        n=n, ho=ho, wo=wo, hp=hp, wsplit=wsplit, cin=cin, cout=cout, stride=s,
        tap_dots=tap_dots, target_m=target_m, budget=budget)
    t_tiles = ho // th
    hwin = s * th + 2

    # Zero-pad once in XLA (+2 rows/cols, ~1x extra write) -- no row gather /
    # im2col.  Fold the width stride into the lane dim (free reshape).
    xp = jnp.pad(x_nhwc, ((0, 0), (1, 1), (1, 1), (0, 0)))
    xp = xp.reshape(n, hp, wsplit, lanes)

    if resident:
        # Whole padded sample resident in VMEM; block index only tracks batch,
        # so it is DMA'd once per sample and row tiles slice it in-kernel.
        x_in = xp
        x_spec = pl.BlockSpec((None, hp, wsplit, lanes),
                              lambda ni, ti: (ni, 0, 0, 0))
    else:
        # Fallback for samples too big to keep resident: per-tile minimal-halo
        # row windows (~(1 + 2/(s*th))x bytes, not 3x im2col).
        # TODO(synk): replace with in-kernel manual DMA (memory_space=pl.ANY)
        #             to avoid this XLA round trip entirely for huge images.
        ridx = (np.arange(t_tiles)[:, None] * (s * th)
                + np.arange(hwin)[None, :]).reshape(-1).astype(np.int32)
        x_in = jnp.take(xp, jnp.asarray(ridx), axis=1).reshape(
            n * t_tiles, hwin, wsplit, lanes)
        x_spec = pl.BlockSpec((None, hwin, wsplit, lanes),
                              lambda ni, ti: (ni * t_tiles + ti, 0, 0, 0))

    w_spec = pl.BlockSpec((9 * cin, cout), lambda ni, ti: (0, 0))
    b_spec = pl.BlockSpec((1, cout), lambda ni, ti: (0, 0))

    common = dict(stride=s, th=th, wo=wo, cin=cin, cout=cout,
                  resident=resident, tap_dots=tap_dots,
                  negative_slope=negative_slope)
    flops = 2 * n * ho * wo * 9 * cin * cout
    bytes_accessed = x_in.size * 2 + w.size * 2 + b.size * 4

    if fuse:
        assert fc_w.shape == (ho * wo, cout), (fc_w.shape, ho, wo, cout)
        kernel = functools.partial(_conv_fc_kernel, **common)
        in_specs = [x_spec, w_spec, b_spec,
                    pl.BlockSpec((th * wo, cout), lambda ni, ti: (ti, 0)),
                    pl.BlockSpec((1, 1), lambda ni, ti: (0, 0))]
        ins = (x_in, w, b, fc_w, fc_b)
        out_shape = jax.ShapeDtypeStruct((n, 1), jnp.float32)
        out_spec = pl.BlockSpec((1, 1), lambda ni, ti: (ni, 0))
        dims = ("parallel", "arbitrary")      # output revisited across row tiles
        flops += 2 * n * ho * wo * cout
        bytes_accessed += fc_w.size * 2 + fc_b.size * 4 + n * 4
    else:
        kernel = functools.partial(_conv_kernel, **common)
        in_specs = [x_spec, w_spec, b_spec]
        ins = (x_in, w, b)
        out_shape = jax.ShapeDtypeStruct((n, ho * wo, cout), jnp.bfloat16)
        out_spec = pl.BlockSpec((None, th * wo, cout),
                                lambda ni, ti: (ni, ti, 0))
        dims = ("parallel", "parallel")
        bytes_accessed += n * ho * wo * cout * 2

    out = pl.pallas_call(
        kernel,
        out_shape=out_shape,
        grid=(n, t_tiles),
        in_specs=in_specs,
        out_specs=out_spec,
        compiler_params=pltpu.CompilerParams(
            dimension_semantics=dims, vmem_limit_bytes=limit_bytes),
        cost_estimate=pl.CostEstimate(flops=int(flops), transcendentals=0,
                                      bytes_accessed=int(bytes_accessed)),
    )(*ins)

    if fuse:
        return out                                   # (N, 1) f32 critic scores
    return out.reshape(n, ho, wo, cout)              # (N, Ho, Wo, Cout) bf16


def conv3x3_lrelu(x_nhwc, w, b, *, stride, target_m=None):
    return _conv_layer(x_nhwc, w, b, stride=stride, target_m=target_m)


def conv3x3_lrelu_fc(x_nhwc, w, b, fc_w, fc_b, *, stride, target_m=None):
    return _conv_layer(x_nhwc, w, b, stride=stride, fc_w=fc_w, fc_b=fc_b,
                       target_m=target_m)


# ----------------------------------------------------------------------------
# Parameter construction (deterministic, PyTorch-like fan-in scaling).
# ----------------------------------------------------------------------------
def init_critic_params(key, nc, ndf, data_shape, depth):
    h, w = data_shape
    keys = jax.random.split(key, 2 * (depth + 1) + 2)
    convs = []
    cin = nc
    plan = [(ndf, 1)] + [(ndf * (2 ** (d + 1)), 2) for d in range(depth)]
    for i, (cout, s) in enumerate(plan):
        wv = (1.0 / np.sqrt(9 * cin)) * jax.random.normal(
            keys[2 * i], (9 * cin, cout), jnp.float32)
        bv = 0.05 * jax.random.normal(keys[2 * i + 1], (1, cout), jnp.float32)
        convs.append(dict(w=wv.astype(jnp.bfloat16), b=bv,
                          stride=s, cin=cin, cout=cout))
        cin = cout
        h //= s
        w //= s

    cf, hf, wf = cin, h, w                 # PyTorch encoder.output_shape (C,H,W)
    flat = cf * hf * wf
    fc_w = ((1.0 / np.sqrt(flat)) * jax.random.normal(
        keys[-2], (flat,), jnp.float32)).astype(jnp.bfloat16)
    # Permute fc weights once from NCHW-flatten to NHWC-flatten order so the
    # fused conv+fc kernel consumes the conv activations directly.
    hh = np.arange(hf)[:, None, None]
    ww = np.arange(wf)[None, :, None]
    cc = np.arange(cf)[None, None, :]
    perm = (cc * hf * wf + hh * wf + ww).reshape(-1)
    fc_w_nhwc = fc_w[jnp.asarray(perm)].reshape(hf * wf, cf)
    fc_b = 0.05 * jax.random.normal(keys[-1], (1, 1), jnp.float32)
    return dict(convs=convs,
                fc_w_nhwc=fc_w_nhwc,                       # (Hf*Wf, Cf) bf16
                fc_w_nchw=fc_w.astype(jnp.float32).reshape(flat, 1),
                fc_b=fc_b,
                enc_out_shape=(cf, hf, wf))


# ----------------------------------------------------------------------------
# Critic forward (Pallas) and a pure-XLA reference with matching arithmetic.
# ----------------------------------------------------------------------------
def critic_forward(params, x_nchw, *, target_m=None):
    """x_nchw: (N, nc, H, W) f32 -> (N, 1) f32 critic scores."""
    x = jnp.transpose(x_nchw, (0, 2, 3, 1)).astype(jnp.bfloat16)   # NHWC, bf16
    convs = params["convs"]
    for layer in convs[:-1]:
        x = conv3x3_lrelu(x, layer["w"], layer["b"], stride=layer["stride"],
                          target_m=target_m)
    last = convs[-1]
    # fc Linear(flat, 1) fused into the last conv's epilogue.
    return conv3x3_lrelu_fc(x, last["w"], last["b"], params["fc_w_nhwc"],
                            params["fc_b"], stride=last["stride"],
                            target_m=target_m)


def critic_forward_reference(params, x_nchw):
    """Pure-JAX (XLA) reference mirroring the kernels' bf16/f32 arithmetic."""
    x = jnp.transpose(x_nchw, (0, 2, 3, 1)).astype(jnp.bfloat16)
    for layer in params["convs"]:
        w4 = layer["w"].reshape(3, 3, layer["cin"], layer["cout"])   # HWIO
        y = jax.lax.conv_general_dilated(
            x, w4, window_strides=(layer["stride"],) * 2,
            padding=((1, 1), (1, 1)),
            dimension_numbers=("NHWC", "HWIO", "NHWC"),
            preferred_element_type=jnp.float32)
        y = y + layer["b"]
        y = jnp.where(y >= 0.0, y, NEG_SLOPE * y)
        x = y.astype(jnp.bfloat16)
    # PyTorch semantics: flatten the encoder output in NCHW order.
    n = x.shape[0]
    flat = jnp.transpose(x, (0, 3, 1, 2)).reshape(n, -1).astype(jnp.float32)
    return flat @ params["fc_w_nchw"] + params["fc_b"]


# ----------------------------------------------------------------------------
if __name__ == "__main__":
    nc, ndf, depth = 4, 64, 2
    data_shape = (32, 32)
    batch = 2

    key = jax.random.PRNGKey(0)
    k_param, k_input = jax.random.split(key)
    params = init_critic_params(k_param, nc, ndf, data_shape, depth)
    x = jax.random.normal(k_input, (batch, nc, *data_shape), jnp.float32)

    # target_m=128 so the small test also exercises the multi-row-tile grid,
    # the stride-2 multi-tile path and the resident-window slicing; realistic
    # image sizes use the per-generation default (target_m=None).
    out = critic_forward(params, x, target_m=128)
    out = jax.block_until_ready(out)

    assert out.shape == (batch, 1), out.shape
    assert out.dtype == jnp.float32

    ref = jax.block_until_ready(critic_forward_reference(params, x))
    np.testing.assert_allclose(np.asarray(out), np.asarray(ref),
                               rtol=2e-2, atol=2e-2)
    print("KERNEL_OK")
</pallas_src>

<mosaic_0001>
module attributes {stable_mosaic.version = 11 : i64} {
  func.func @_conv_kernel(%arg0: i32, %arg1: i32, %arg2: memref<1x34x34x4xbf16, #tpu.memory_space<vmem>>, %arg3: memref<36x64xbf16, #tpu.memory_space<vmem>>, %arg4: memref<1x64xf32, #tpu.memory_space<vmem>>, %arg5: memref<1x128x64xbf16, #tpu.memory_space<vmem>>) attributes {dimension_semantics = [#tpu.dimension_semantics<parallel>, #tpu.dimension_semantics<parallel>], iteration_bounds = array<i64: 2, 8>, scalar_prefetch = 0 : i64, scratch_operands = 0 : i64, tpu.core_type = #tpu.core_type<tc>, window_params = [{transform_indices = @transform_0, window_bounds = array<i64: 1, 34, 34, 4>}, {pipeline_mode = #tpu.pipeline_mode<synchronous>, transform_indices = @transform_1, window_bounds = array<i64: 36, 64>}, {pipeline_mode = #tpu.pipeline_mode<synchronous>, transform_indices = @transform_2, window_bounds = array<i64: 1, 64>}, {transform_indices = @transform_3, window_bounds = array<i64: 1, 128, 64>}]} {
    %c4_i32 = arith.constant 4 : i32
    %0 = arith.muli %arg1, %c4_i32 : i32
    %c0 = arith.constant 0 : index
    %1 = arith.index_cast %0 : i32 to index
    %c0_0 = arith.constant 0 : index
    %c0_1 = arith.constant 0 : index
    %2 = vector.load %arg2[%c0, %1, %c0_0, %c0_1] : memref<1x34x34x4xbf16, #tpu.memory_space<vmem>>, vector<1x6x34x4xbf16>
    %3 = vector.shape_cast %2 : vector<1x6x34x4xbf16> to vector<6x34x4xbf16>
    %4 = vector.extract_strided_slice %3 {offsets = [0, 0, 0], sizes = [4, 34, 4], strides = [1, 1, 1]} : vector<6x34x4xbf16> to vector<4x34x4xbf16>
    %5 = vector.extract_strided_slice %3 {offsets = [1, 0, 0], sizes = [4, 34, 4], strides = [1, 1, 1]} : vector<6x34x4xbf16> to vector<4x34x4xbf16>
    %6 = vector.extract_strided_slice %3 {offsets = [2, 0, 0], sizes = [4, 34, 4], strides = [1, 1, 1]} : vector<6x34x4xbf16> to vector<4x34x4xbf16>
    %7 = vector.extract_strided_slice %4 {offsets = [0, 0, 0], sizes = [4, 32, 4], strides = [1, 1, 1]} : vector<4x34x4xbf16> to vector<4x32x4xbf16>
    %8 = vector.extract_strided_slice %4 {offsets = [0, 1, 0], sizes = [4, 32, 4], strides = [1, 1, 1]} : vector<4x34x4xbf16> to vector<4x32x4xbf16>
    %9 = vector.extract_strided_slice %4 {offsets = [0, 2, 0], sizes = [4, 32, 4], strides = [1, 1, 1]} : vector<4x34x4xbf16> to vector<4x32x4xbf16>
    %10 = vector.extract_strided_slice %5 {offsets = [0, 0, 0], sizes = [4, 32, 4], strides = [1, 1, 1]} : vector<4x34x4xbf16> to vector<4x32x4xbf16>
    %11 = vector.extract_strided_slice %5 {offsets = [0, 1, 0], sizes = [4, 32, 4], strides = [1, 1, 1]} : vector<4x34x4xbf16> to vector<4x32x4xbf16>
    %12 = vector.extract_strided_slice %5 {offsets = [0, 2, 0], sizes = [4, 32, 4], strides = [1, 1, 1]} : vector<4x34x4xbf16> to vector<4x32x4xbf16>
    %13 = vector.extract_strided_slice %6 {offsets = [0, 0, 0], sizes = [4, 32, 4], strides = [1, 1, 1]} : vector<4x34x4xbf16> to vector<4x32x4xbf16>
    %14 = vector.extract_strided_slice %6 {offsets = [0, 1, 0], sizes = [4, 32, 4], strides = [1, 1, 1]} : vector<4x34x4xbf16> to vector<4x32x4xbf16>
    %15 = vector.extract_strided_slice %6 {offsets = [0, 2, 0], sizes = [4, 32, 4], strides = [1, 1, 1]} : vector<4x34x4xbf16> to vector<4x32x4xbf16>
    %16 = tpu.concatenate %7, %8, %9, %10, %11, %12, %13, %14, %15 in 2 : vector<4x32x4xbf16>, vector<4x32x4xbf16>, vector<4x32x4xbf16>, vector<4x32x4xbf16>, vector<4x32x4xbf16>, vector<4x32x4xbf16>, vector<4x32x4xbf16>, vector<4x32x4xbf16>, vector<4x32x4xbf16> -> vector<4x32x36xbf16>
    %17 = vector.shape_cast %16 : vector<4x32x36xbf16> to vector<128x36xbf16>
    %c0_2 = arith.constant 0 : index
    %c0_3 = arith.constant 0 : index
    %18 = vector.load %arg3[%c0_2, %c0_3] : memref<36x64xbf16, #tpu.memory_space<vmem>>, vector<36x64xbf16>
    %cst = arith.constant dense<0.000000e+00> : vector<128x64xf32>
    %19 = tpu.matmul %17, %18, %cst {dimension_numbers = #tpu.dot_dimension_numbers<[1], [0], [0], [1], [0, 0, 1, 1], [], []>} : vector<128x36xbf16>, vector<36x64xbf16>, vector<128x64xf32> -> vector<128x64xf32>
    %c0_4 = arith.constant 0 : index
    %c0_5 = arith.constant 0 : index
    %20 = vector.load %arg4[%c0_4, %c0_5] : memref<1x64xf32, #tpu.memory_space<vmem>>, vector<1x64xf32>
    %21 = vector.broadcast %20 : vector<1x64xf32> to vector<128x64xf32>
    %22 = arith.addf %19, %21 : vector<128x64xf32>
    %cst_6 = arith.constant 0.000000e+00 : f32
    %23 = vector.broadcast %cst_6 : f32 to vector<128x64xf32>
    %24 = arith.cmpf oge, %22, %23 : vector<128x64xf32>
    %cst_7 = arith.constant 2.000000e-01 : f32
    %25 = vector.broadcast %cst_7 : f32 to vector<128x64xf32>
    %26 = arith.mulf %25, %22 : vector<128x64xf32>
    %27 = arith.select %24, %22, %26 : vector<128x64xi1>, vector<128x64xf32>
    %28 = arith.truncf %27 : vector<128x64xf32> to vector<128x64xbf16>
    %c0_8 = arith.constant 0 : index
    %c0_9 = arith.constant 0 : index
    %c0_10 = arith.constant 0 : index
    %29 = vector.load %arg5[%c0_8, %c0_9, %c0_10] : memref<1x128x64xbf16, #tpu.memory_space<vmem>>, vector<1x128x64xbf16>
    %30 = vector.shape_cast %29 : vector<1x128x64xbf16> to vector<128x64xbf16>
    %31 = vector.shape_cast %28 : vector<128x64xbf16> to vector<1x128x64xbf16>
    tpu.vector_store %arg5[%c0_8, %c0_9, %c0_10], %31 {strides = array<i32>} : memref<1x128x64xbf16, #tpu.memory_space<vmem>>, vector<1x128x64xbf16>,
    return
  }
  func.func @transform_0(%arg0: i32, %arg1: i32) -> (i32, i32, i32, i32) {
    %c0_i32 = arith.constant 0 : i32
    %c0_i32_0 = arith.constant 0 : i32
    %c0_i32_1 = arith.constant 0 : i32
    %c0_i32_2 = arith.constant 0 : i32
    return %arg0, %c0_i32, %c0_i32_0, %c0_i32_1 : i32, i32, i32, i32
  }
  func.func @transform_1(%arg0: i32, %arg1: i32) -> (i32, i32) {
    %c0_i32 = arith.constant 0 : i32
    %c0_i32_0 = arith.constant 0 : i32
    %c0_i32_1 = arith.constant 0 : i32
    return %c0_i32, %c0_i32_0 : i32, i32
  }
  func.func @transform_2(%arg0: i32, %arg1: i32) -> (i32, i32) {
    %c0_i32 = arith.constant 0 : i32
    %c0_i32_0 = arith.constant 0 : i32
    %c0_i32_1 = arith.constant 0 : i32
    return %c0_i32, %c0_i32_0 : i32, i32
  }
  func.func @transform_3(%arg0: i32, %arg1: i32) -> (i32, i32, i32) {
    %c0_i32 = arith.constant 0 : i32
    %c0_i32_0 = arith.constant 0 : i32
    return %arg0, %arg1, %c0_i32 : i32, i32, i32
  }
}

</mosaic_0001>

<bundles_post_ra>
// kernel: tpu_custom_call.1
= control target key start
LH: loop header
LB: loop body
LE: loop exit
PB: predicated region body
PF: predicated region fallthrough
CT: control target
= control target key end

     0   :  { %s1339_s12 = smov 0   ;;  %s1341_s13 = smov 0   ;;  %s1798_s0 = inlined_call_operand.vmem [shape: bf16[2,34,34,4], index: 0, kind: input, shape index: {}]   ;;  %s1799_s1 = inlined_call_operand.vmem [shape: bf16[36,64], index: 1, kind: input, shape index: {}]   ;;  %s1800_s2 = inlined_call_operand.vmem [shape: f32[1,64], index: 2, kind: input, shape index: {}]   ;;  %s1801_s3 = inlined_call_operand.vmem [shape: bf16[2,1024,64], index: 3, kind: output, shape index: {}]  }
   0x1   :  { %s1343_s14 = smov 0   ;;  %s1345_s15 = smov 0  }
   0x2   :  { %s1347_s16 = smov 0  }
   0x3 LB: > { %s22_s17 = sadd.s32 1, %s1301_s14  ;;  %s25_s18 = sadd.s32 1, %s1305_s15  ;;  %s1309_s16 = sphi %s1347_s16, %s13_s16   ;;  %s1305_s15 = sphi %s1345_s15, %s1805_s15   ;;  %s1301_s14 = sphi %s1343_s14, %s1804_s14   ;;  %s1297_s13 = sphi %s1341_s13, %s1803_s13   ;;  %s1293_s12 = sphi %s1339_s12, %s1802_s12  }
   0x4   : > { %p23_p0 = scmp.ge.s32.totalorder %s22_s17, 8  ;;  %p1087_p1 = scmp.ge.s32.totalorder %s1309_s16, 1 }
   0x5   : > { %p151_p2 = scmp.lt.s32.totalorder %s1309_s16, 17 }
   0x6   : > { %s1807_s17 = smov (%p23_p0, %s22_s17), 0  ;;  %s1809_s18 = smov (!%p23_p0, %s25_s18), %s1305_s15 }
   0x7   : > { %p152_p3 = pnand %p1087_p1, %p151_p2  ;;  %p27_p4 = scmp.ge.s32.totalorder %s1809_s18, 2 }
   0x8   : > { %p179_p5 = scmp.lt.s32.totalorder (!%p152_p3), %s1297_s13, 1  ;;  %s1143_s19 = smul.u32 (!%p152_p3), 80, %s1293_s12 }
   0x9   : > { %s1811_s18 = smov (%p27_p4, %s1809_s18), 0  ;;  %155 = sbr.rel (%p152_p3) target bundleno = 469 (0x1d5), region = 32 }
   0xa   : > { %s1311_s25 = smov (!%p152_p3), 12   ;;  %s1312_s26 = smov (!%p152_p3), 8  }
   0xb   : > { %s1313_s27 = smov (!%p152_p3), 4   ;;  %s1314_s28 = smov (!%p152_p3), 16  }
   0xc   : > { %s1315_s29 = smov (!%p152_p3), 20   ;;  %s1316_s30 = smov (!%p152_p3), 24  }
   0xd   : > { %s1317_s8 = smov (!%p152_p3), 28   ;;  %s1318_s11 = smov (!%p152_p3), 32  }
   0xe   : > { %s1813_s13 = smov (!%p179_p5, %s1297_s13), 1  ;;  %vm378_vm0 = vcmask 1046528   ;;  %vm281_vm1 = vsmask.f32 7424  ;;  %vm767_vm2 = vcmask 1041408   ;;  %vm587_vm3 = vcmask 31744  }
   0xf   : > { %s1201_s20 = smul.u32 680, %s1813_s13  ;;  %vm604_vm4 = vcmask 64512   ;;  %vm638_vm5 = vcmask 130048   ;;  %vm621_vm6 = vcmask 97280   ;;  %vm655_vm7 = vcmask 162816  }
  0x10   : > { %vm672_vm8 = vcmask 195584   ;;  %vm689_vm9 = vcmask 228352   ;;  %vm706_vm10 = vcmask 261120   ;;  %vm750_vm11 = vcmask 293888  }
  0x11   : > { %s183_s23 = scalar_lea.vmem %s1798_s0, %s1201_s20  ;;  %s1090_s20 = sshll.u32 %s1813_s13, 7  ;;  %vm980_vm13 = vcmask 519168  }
  0x12   : > { %s1378_s24 = scalar_lea.vmem %s183_s23, %s1143_s19  ;;  %s1089_s19 = sshll.u32 %s1293_s12, 4 }
  0x13   : > { %v1381_v0 = vld [vmem:[%s1378_s24 + $0x3c] sm:$0xff]   ;;  %v1384_v1 = vld [vmem:[%s1378_s24 + $0x14] sm:$0xff]   ;;  %v1391_v2 = vld [vmem:[%s1378_s24 + $0x28] sm:$0xff]   ;;  %p187_p6 = scmp.lt.s32.totalorder %s1089_s19, 127 }
  0x14   : > { %433 = vrot.lane.b32.xlu1 %v1381_v0, %s1311_s25  ;;  %425 = vrot.lane.b32.xlu0 %v1384_v1, %s1311_s25  ;;  %v1394_v3 = vld [vmem:[%s1378_s24 + $0x30] sm:$0xff]   ;;  %v345_v4 = vshll.u32 %v1381_v0, 16  ;;  %v389_v5 = vrot.slane %v1391_v2, 1  ;;  %v1400_v7 = vld [vmem:[%s1378_s24] sm:$0xff]   ;;  %v323_v30 = vshrl.u32 %v1391_v2, 16  ;;  %v325_v34 = vshll.u32 %v1391_v2, 16 }
  0x15   : > { %v390_v6 = vrot.slane %v1394_v3, 1  ;;  %v1403_v8 = vld [vmem:[%s1378_s24 + $0x8] sm:$0xff]   ;;  %v1256_v9 = vld [vmem:[%s1378_s24 + $0x38] ss:$0 sps:$4 sm:$0x11]   ;;  %v330_v10 = vshll.u32 %v1394_v3, 16 }
  0x16   : > { %v379_v12 = vrot.slane %v1400_v7, 1  ;;  %v380_v13 = vrot.slane %v1403_v8, 1  ;;  %v290_v14 = vshll.u32 %v1403_v8, 16  ;;  %v392_v15 = vrot.slane %v1256_v9, 1  ;;  %v1427_v31 = vld [vmem:[%s1378_s24 + $0x44] sm:$0xff]   ;;  %v1437_v41 = vld [vmem:[%s1378_s24 + $0x1c] sm:$0xff]  }
  0x17   : > { %v1408_v11 = vsel %vm378_vm0, %v389_v5, %v390_v6  ;;  %v1257_v16 = vld [vmem:[%s1378_s24 + $0x10] ss:$0 sps:$4 sm:$0x11]   ;;  %v294_v17 = vshrl.u32 %v1403_v8, 16  ;;  %v283_v18 = vshrl.u32 %v1400_v7, 16  ;;  %v285_v21 = vshll.u32 %v1400_v7, 16 }
  0x18   : > { %407 = vrot.lane.b32.xlu1 %v1408_v11, %s1312_s26  ;;  %v381_v19 = vsel %vm378_vm0, %v379_v12, %v380_v13  ;;  %v292_v20 = vrot.slane %v290_v14, 1  ;;  %v332_v22 = vrot.slane %v330_v10, 1  ;;  %v1422_v23 = vsel %vm378_vm0, %v390_v6, %v392_v15  ;;  %v1444_v47 = vld [vmem:[%s1378_s24 + $0x4c] ss:$0 sps:$4 sm:$0x11]   ;;  %v1461_v56 = vld [vmem:[%s1378_s24 + $0x64] sm:$0xff]  }
  0x19   : > { %399 = vrot.lane.b32.xlu0 %v381_v19, %s1312_s26  ;;  %v382_v24 = vrot.slane %v1257_v16, 1  ;;  %v298_v25 = vshll.u32 %v1257_v16, 16  ;;  %v334_v26 = vshrl.u32 %v1394_v3, 16  ;;  %v287_v28 = vrot.slane %v285_v21, 1  ;;  %v1469_v60 = vld [vmem:[%s1378_s24 + $0x6c] sm:$0xff]   ;;  %s1815_s19 = smov (!%p187_p6, %s1089_s19), 127 }
  0x1a   : > { %v296_v27 = vor.u32 %v294_v17, %v292_v20  ;;  %v338_v29 = vshll.u32 %v1256_v9, 16  ;;  %v327_v39 = vrot.slane %v325_v34, 1  ;;  %v343_v42 = vshrl.u32 %v1381_v0, 16  ;;  %v1450_v49 = vld [vmem:[%s1378_s24 + $0x24] ss:$0 sps:$4 sm:$0x11]   ;;  %s190_s23 = sadd.s32 %s1090_s20, %s1815_s19 }
  0x1b   : > { %v383_v32 = vsel %vm378_vm0, %v380_v13, %v382_v24  ;;  %v300_v33 = vrot.slane %v298_v25, 1  ;;  %v288_v35 = vor.u32 %v287_v28, %v283_v18  ;;  %v336_v36 = vor.u32 %v334_v26, %v332_v22  ;;  %v1267_v5 = vld [vmem:[%s1378_s24 + $0x74] ss:$0 sps:$4 sm:$0x11]  }
  0x1c   : > { %409 = vrot.lane.b32.xlu1 %v1422_v23, %s1312_s26  ;;  %v340_v37 = vrot.slane %v338_v29, 1  ;;  %v347_v43 = vrot.slane %v345_v4, 1  ;;  %v305_v44 = vshll.u32 %v1384_v1, 16  ;;  %v328_v45 = vor.u32 %v327_v39, %v323_v30 }
  0x1d   : > { %401 = vrot.lane.b32.xlu0 %v383_v32, %s1312_s26  ;;  %v301_v38 = vsel %vm281_vm1, %v296_v27, %v300_v33  ;;  %v293_v40 = vsel %vm281_vm1, %v288_v35, %v292_v20  ;;  %v350_v46 = vshll.u32 %v1427_v31, 16  ;;  %v303_v51 = vshrl.u32 %v1384_v1, 16 }
  0x1e   : > { %v1447_v48 = vsel %vm281_vm1, %v336_v36, %v340_v37  ;;  %v1454_v50 = vsel %vm281_vm1, %v328_v45, %v332_v22  ;;  %v307_v52 = vrot.slane %v305_v44, 1  ;;  %v310_v53 = vshll.u32 %v1437_v41, 16 }
  0x1f   : > { %v348_v54 = vor.u32 %v347_v43, %v343_v42  ;;  %v352_v55 = vrot.slane %v350_v46, 1  ;;  %v354_v57 = vshrl.u32 %v1427_v31, 16  ;;  %v358_v58 = vshll.u32 %v1444_v47, 16  ;;  %v1522_v42 = vld [vmem:[%s1378_s24 + $0x50] sm:$0xff]   ;;  %v1536_v46 = vld [vmem:[%s1378_s24 + $0x58] sm:$0xff]  }
  0x20   : > { %364 = vrot.lane.b32.xlu1 %v301_v38, %s1313_s27  ;;  %v318_v59 = vshll.u32 %v1450_v49, 16  ;;  %v308_v61 = vor.u32 %v307_v52, %v303_v51  ;;  %v312_v62 = vrot.slane %v310_v53, 1  ;;  %v314_v63 = vshrl.u32 %v1437_v41, 16 }
  0x21   : > { %362 = vrot.lane.b32.xlu0 %v293_v40, %s1313_s27  ;;  %v1475_v4 = vsel %vm281_vm1, %v348_v54, %v352_v55  ;;  %v356_v6 = vor.u32 %v354_v57, %v352_v55  ;;  %v360_v9 = vrot.slane %v358_v58, 1  ;;  %v531_v10 = vshrl.u32 %v1461_v56, 16  ;;  %v1264_v54 = vld [vmem:[%s1378_s24 + $0x60] ss:$0 sps:$4 sm:$0x11]   ;;  %s1091_s24 = sshll.u32 %s190_s23, 2 }
  0x22   : > { %v533_v12 = vshll.u32 %v1461_v56, 16  ;;  %v320_v13 = vrot.slane %v318_v59, 1  ;;  %v394_v14 = vrot.slane %v1381_v0, 1  ;;  %v538_v15 = vshll.u32 %v1469_v60, 16 }
  0x23   : > { %v1485_v16 = vsel %vm281_vm1, %v308_v61, %v312_v62  ;;  %v316_v17 = vor.u32 %v314_v63, %v312_v62  ;;  %v542_v19 = vshrl.u32 %v1469_v60, 16  ;;  %v395_v20 = vrot.slane %v1427_v31, 1  ;;  %v1268_v57 = vld [vmem:[%s1799_s1 + $0x10] ss:$0 sps:$4 sm:$0x33]   ;;  %v1269_v63 = vld [vmem:[%s1799_s1 + $0x8] sm:$0xff]  }
  0x24   : > { %372 = vrot.lane.b32.xlu1 %v1447_v48, %s1313_s27  ;;  %v535_v18 = vrot.slane %v533_v12, 1  ;;  %v540_v21 = vrot.slane %v538_v15, 1  ;;  %v546_v22 = vshll.u32 %v1267_v5, 16  ;;  %v566_v24 = vrot.slane %v1461_v56, 1  ;;  %1199 = vmatprep.subr.msk.bf16.mxu0 %vm767_vm2, %v1268_v57 }
  0x25   : > { %370 = vrot.lane.b32.xlu0 %v1454_v50, %s1313_s27  ;;  %v1493_v25 = vsel %vm281_vm1, %v356_v6, %v360_v9  ;;  %v567_v27 = vrot.slane %v1469_v60, 1  ;;  %v569_v28 = vrot.slane %v1267_v5, 1  ;;  %v384_v29 = vrot.slane %v1384_v1, 1  ;;  %1200 = vmatprep.subr.msk.bf16.mxu1 %vm767_vm2, %v1268_v57 }
  0x26   : > { %v536_v26 = vor.u32 %v535_v18, %v531_v10  ;;  %v385_v30 = vrot.slane %v1437_v41, 1  ;;  %v544_v32 = vor.u32 %v542_v19, %v540_v21  ;;  %v548_v33 = vrot.slane %v546_v22, 1  ;;  %v1270_v10 = vld [vmem:[%s1799_s1] sm:$0xff]  }
  0x27   : > { %v1501_v34 = vsel %vm281_vm1, %v316_v17, %v320_v13  ;;  %v1507_v36 = vsel %vm378_vm0, %v566_v24, %v567_v27  ;;  %v1510_v37 = vsel %vm378_vm0, %v567_v27, %v569_v28  ;;  %v1518_v39 = vsel %vm378_vm0, %v394_v14, %v395_v20 }
  0x28   : > { %435 = vrot.lane.b32.xlu1 %v1427_v31, %s1311_s25  ;;  %v1504_v35 = vsel %vm281_vm1, %v536_v26, %v540_v21  ;;  %v1515_v38 = vsel %vm281_vm1, %v544_v32, %v548_v33  ;;  %v397_v40 = vrot.slane %v1444_v47, 1  ;;  %v1527_v43 = vsel %vm378_vm0, %v384_v29, %v385_v30 }
  0x29   : > { %427 = vrot.lane.b32.xlu0 %v1437_v41, %s1311_s25  ;;  %v387_v44 = vrot.slane %v1450_v49, 1  ;;  %v447_v47 = vshll.u32 %v1522_v42, 16  ;;  %v445_v49 = vshrl.u32 %v1522_v42, 16  ;;  %v452_v53 = vshll.u32 %v1536_v46, 16 }
  0x2a   : > { %v1533_v45 = vsel %vm378_vm0, %v395_v20, %v397_v40  ;;  %v456_v55 = vshrl.u32 %v1536_v46, 16  ;;  %v460_v61 = vshll.u32 %v1264_v54, 16  ;;  %v769_v62 = vsel %vm767_vm2, %v1268_v57, 0 }
  0x2b   : > { %v388_v51 = vsel %vm378_vm0, %v385_v30, %v387_v44  ;;  %v449_v52 = vrot.slane %v447_v47, 1  ;;  %v454_v59 = vrot.slane %v452_v53, 1  ;;  %1172 = vmatpush3.bf16.msra.mxu0 %v769_v62  ;;  %1196 = vmatpush3.bf16.msra.mxu1 %v769_v62  ;;  %v480_v13 = vrot.slane %v1522_v42, 1 }
  0x2c   : > { %472 = vrot.lane.b32.xlu1 %v1475_v4, %s1314_s28  ;;  %v462_v9 = vrot.slane %v460_v61, 1  ;;  %1173 = vmatprep.subr.bf16.mxu0 %v1269_v63  ;;  %v481_v14 = vrot.slane %v1536_v46, 1  ;;  %v483_v17 = vrot.slane %v1264_v54, 1 }
  0x2d   : > { %464 = vrot.lane.b32.xlu0 %v1485_v16, %s1314_s28  ;;  %v450_v58 = vor.u32 %v449_v52, %v445_v49  ;;  %v458_v6 = vor.u32 %v456_v55, %v454_v59  ;;  %1194 = vmatprep.subr.bf16.mxu1 %v1269_v63 }
  0x2e   : > { %v482_v15 = vsel %vm378_vm0, %v480_v13, %v481_v14  ;;  %v484_v18 = vsel %vm378_vm0, %v481_v14, %v483_v17 }
  0x2f   : > { %v455_v5 = vsel %vm281_vm1, %v450_v58, %v454_v59  ;;  %1174 = vmatpush3.bf16.msra.mxu0 %v1269_v63  ;;  %1197 = vmatpush3.bf16.msra.mxu1 %v1269_v63  ;;  %v463_v12 = vsel %vm281_vm1, %v458_v6, %v462_v9 }
  0x30   : > { %474 = vrot.lane.b32.xlu1 %v1493_v25, %s1314_s28  ;;  %1175 = vmatprep.subr.bf16.mxu0 %v1270_v10 }
  0x31   : > { %466 = vrot.lane.b32.xlu0 %v1501_v34, %s1314_s28  ;;  %1195 = vmatprep.subr.bf16.mxu1 %v1270_v10 }
  0x33   : > { %1176 = vmatpush3.bf16.msra.mxu0 %v1270_v10  ;;  %1198 = vmatpush3.bf16.msra.mxu1 %v1270_v10 }
  0x34   : > { %493 = vrot.lane.b32.xlu1 %v1518_v39, %s1315_s29 }
  0x35   : > { %485 = vrot.lane.b32.xlu0 %v1527_v43, %s1315_s29 }
  0x38   : > { %495 = vrot.lane.b32.xlu1 %v1533_v45, %s1315_s29 }
  0x39   : > { %487 = vrot.lane.b32.xlu0 %v388_v51, %s1315_s29 }
  0x3c   : > { %519 = vrot.lane.b32.xlu1 %v1522_v42, %s1316_s30 }
  0x3d   : > { %511 = vrot.lane.b32.xlu0 %v1391_v2, %s1316_s30 }
  0x40   : > { %521 = vrot.lane.b32.xlu1 %v1536_v46, %s1316_s30 }
  0x41   : > { %513 = vrot.lane.b32.xlu0 %v1394_v3, %s1316_s30 }
  0x44   : > { %558 = vrot.lane.b32.xlu1 %v455_v5, %s1317_s8 }
  0x45   : > { %550 = vrot.lane.b32.xlu0 %v1454_v50, %s1317_s8 }
  0x48   : > { %560 = vrot.lane.b32.xlu1 %v463_v12, %s1317_s8 }
  0x49   : > { %552 = vrot.lane.b32.xlu0 %v1447_v48, %s1317_s8 }
  0x4c   : > { %579 = vrot.lane.b32.xlu1 %v482_v15, %s1318_s11 }
  0x4d   : > { %571 = vrot.lane.b32.xlu0 %v1408_v11, %s1318_s11 }
  0x50   : > { %374 = vrot.lane.b32.xlu1 %v1475_v4, %s1313_s27 }
  0x51   : > { %366 = vrot.lane.b32.xlu0 %v1485_v16, %s1313_s27 }
  0x54   : > { %581 = vrot.lane.b32.xlu1 %v484_v18, %s1318_s11 }
  0x55   : > { %573 = vrot.lane.b32.xlu0 %v1422_v23, %s1318_s11 }
  0x58   : > { %376 = vrot.lane.b32.xlu1 %v1493_v25, %s1313_s27 }
  0x59   : > { %368 = vrot.lane.b32.xlu0 %v1501_v34, %s1313_s27 }
  0x5c   : > { %411 = vrot.lane.b32.xlu1 %v1518_v39, %s1312_s26 }
  0x5d   : > { %403 = vrot.lane.b32.xlu0 %v1527_v43, %s1312_s26 }
  0x60   : > { %413 = vrot.lane.b32.xlu1 %v1533_v45, %s1312_s26 }
  0x61   : > { %405 = vrot.lane.b32.xlu0 %v388_v51, %s1312_s26 }
  0x64   : > { %437 = vrot.lane.b32.xlu1 %v1522_v42, %s1311_s25 }
  0x65   : > { %429 = vrot.lane.b32.xlu0 %v1391_v2, %s1311_s25 }
  0x68   : > { %439 = vrot.lane.b32.xlu1 %v1536_v46, %s1311_s25 }
  0x69   : > { %431 = vrot.lane.b32.xlu0 %v1394_v3, %s1311_s25  ;;  %s1736_s25 = scalar_lea.vmem %s1801_s3, %s1091_s24 }
  0x6c   : > { %476 = vrot.lane.b32.xlu1 %v455_v5, %s1314_s28 }
  0x6d   : > { %468 = vrot.lane.b32.xlu0 %v1454_v50, %s1314_s28 }
  0x70   : > { %478 = vrot.lane.b32.xlu1 %v463_v12, %s1314_s28 }
  0x71   : > { %470 = vrot.lane.b32.xlu0 %v1447_v48, %s1314_s28 }
  0x74   : > { %497 = vrot.lane.b32.xlu1 %v482_v15, %s1315_s29 }
  0x75   : > { %489 = vrot.lane.b32.xlu0 %v1408_v11, %s1315_s29 }
  0x78   : > { %499 = vrot.lane.b32.xlu1 %v484_v18, %s1315_s29 }
  0x79   : > { %491 = vrot.lane.b32.xlu0 %v1422_v23, %s1315_s29 }
  0x7c   : > { %523 = vrot.lane.b32.xlu1 %v1461_v56, %s1316_s30 }
  0x7d   : > { %515 = vrot.lane.b32.xlu0 %v1381_v0, %s1316_s30 }
  0x80   : > { %525 = vrot.lane.b32.xlu1 %v1469_v60, %s1316_s30 }
  0x81   : > { %517 = vrot.lane.b32.xlu0 %v1427_v31, %s1316_s30 }
  0x84   : > { %562 = vrot.lane.b32.xlu1 %v1504_v35, %s1317_s8 }
  0x85   : > { %554 = vrot.lane.b32.xlu0 %v1475_v4, %s1317_s8 }
  0x86   : > { %v434_v11 = vpop.permute.xlu1 %433  ;;  %v426_v23 = vpop.permute.xlu0 %425 }
  0x88   : > { %564 = vrot.lane.b32.xlu1 %v1515_v38, %s1317_s8 }
  0x89   : > { %556 = vrot.lane.b32.xlu0 %v1493_v25, %s1317_s8 }
  0x8a   : > { %v408_v48 = vpop.permute.xlu1 %407 }
  0x8b   : > { %v400_v50 = vpop.permute.xlu0 %399 }
  0x8c   : > { %583 = vrot.lane.b32.xlu1 %v1507_v36, %s1318_s11 }
  0x8d   : > { %575 = vrot.lane.b32.xlu0 %v1518_v39, %s1318_s11 }
  0x8e   : > { %v410_v56 = vpop.permute.xlu1 %409 }
  0x8f   : > { %v402_v60 = vpop.permute.xlu0 %401 }
  0x90   : > { %585 = vrot.lane.b32.xlu1 %v1510_v37, %s1318_s11 }
  0x91   : > { %577 = vrot.lane.b32.xlu0 %v1533_v45, %s1318_s11 }
  0x92   : > { %v365_v4 = vpop.permute.xlu1 %364 }
  0x93   : > { %v363_v16 = vpop.permute.xlu0 %362  ;;  %v591_v59 = vsel %vm587_vm3, %v1403_v8, %v365_v4 }
  0x94   : > { %v589_v38 = vsel %vm587_vm3, %v1400_v7, %v363_v16  ;;  %v608_v9 = vsel %vm604_vm4, %v591_v59, %v402_v60 }
  0x95   : > { %v606_v43 = vsel %vm604_vm4, %v589_v38, %v400_v50 }
  0x96   : > { %v373_v19 = vpop.permute.xlu1 %372  ;;  %v623_v46 = vsel %vm621_vm6, %v606_v43, %v426_v23 }
  0x97   : > { %v371_v20 = vpop.permute.xlu0 %370  ;;  %v599_v52 = vsel %vm587_vm3, %v1394_v3, %v373_v19 }
  0x98   : > { %v597_v36 = vsel %vm587_vm3, %v1391_v2, %v371_v20  ;;  %v616_v63 = vsel %vm604_vm4, %v599_v52, %v410_v56 }
  0x99   : > { %v614_v40 = vsel %vm604_vm4, %v597_v36, %v408_v48 }
  0x9a   : > { %v436_v21 = vpop.permute.xlu1 %435  ;;  %v631_v44 = vsel %vm621_vm6, %v614_v40, %v434_v11 }
  0x9b   : > { %v428_v22 = vpop.permute.xlu0 %427  ;;  %v633_v5 = vsel %vm621_vm6, %v616_v63, %v436_v21 }
  0x9c   : > { %v625_v8 = vsel %vm621_vm6, %v608_v9, %v428_v22 }
  0x9e   : > { %v473_v24 = vpop.permute.xlu1 %472 }
  0x9f   : > { %v465_v25 = vpop.permute.xlu0 %464  ;;  %v648_v2 = vsel %vm638_vm5, %v631_v44, %v473_v24 }
  0xa0   : > { %v640_v51 = vsel %vm638_vm5, %v623_v46, %v465_v25 }
  0xa2   : > { %v475_v26 = vpop.permute.xlu1 %474 }
  0xa3   : > { %v467_v27 = vpop.permute.xlu0 %466  ;;  %v650_v10 = vsel %vm638_vm5, %v633_v5, %v475_v26 }
  0xa4   : > { %v642_v14 = vsel %vm638_vm5, %v625_v8, %v467_v27 }
  0xa6   : > { %v494_v28 = vpop.permute.xlu1 %493 }
  0xa7   : > { %v486_v29 = vpop.permute.xlu0 %485  ;;  %v665_v7 = vsel %vm655_vm7, %v648_v2, %v494_v28 }
  0xa8   : > { %v657_v53 = vsel %vm655_vm7, %v640_v51, %v486_v29 }
  0xaa   : > { %v496_v30 = vpop.permute.xlu1 %495 }
  0xab   : > { %v488_v32 = vpop.permute.xlu0 %487  ;;  %v667_v12 = vsel %vm655_vm7, %v650_v10, %v496_v30 }
  0xac   : > { %v659_v17 = vsel %vm655_vm7, %v642_v14, %v488_v32 }
  0xae   : > { %v520_v33 = vpop.permute.xlu1 %519 }
  0xaf   : > { %v512_v34 = vpop.permute.xlu0 %511  ;;  %v682_v49 = vsel %vm672_vm8, %v665_v7, %v520_v33 }
  0xb0   : > { %v674_v57 = vsel %vm672_vm8, %v657_v53, %v512_v34 }
  0xb2   : > { %v522_v35 = vpop.permute.xlu1 %521 }
  0xb3   : > { %v514_v37 = vpop.permute.xlu0 %513  ;;  %v684_v15 = vsel %vm672_vm8, %v667_v12, %v522_v35 }
  0xb4   : > { %v676_v23 = vsel %vm672_vm8, %v659_v17, %v514_v37 }
  0xb6   : > { %v559_v39 = vpop.permute.xlu1 %558 }
  0xb7   : > { %v551_v42 = vpop.permute.xlu0 %550  ;;  %v699_v54 = vsel %vm689_vm9, %v682_v49, %v559_v39 }
  0xb8   : > { %v691_v61 = vsel %vm689_vm9, %v674_v57, %v551_v42 }
  0xba   : > { %v561_v45 = vpop.permute.xlu1 %560 }
  0xbb   : > { %v553_v47 = vpop.permute.xlu0 %552  ;;  %v701_v18 = vsel %vm689_vm9, %v684_v15, %v561_v45 }
  0xbc   : > { %v693_v50 = vsel %vm689_vm9, %v676_v23, %v553_v47 }
  0xbe   : > { %v580_v55 = vpop.permute.xlu1 %579 }
  0xbf   : > { %v716_v58 = vsel %vm706_vm10, %v699_v54, %v580_v55  ;;  %v572_v62 = vpop.permute.xlu0 %571 }
  0xc0   : > { %1185 = vmatprep.mubr.msk.bf16.mxu1 %vm750_vm11, %v716_v58  ;;  %v708_v3 = vsel %vm706_vm10, %v691_v61, %v572_v62 }
  0xc1   : > { %1177 = vmatprep.mubr.msk.bf16.mxu0 %vm750_vm11, %v708_v3 }
  0xc2   : > { %v375_v6 = vpop.permute.xlu1 %374 }
  0xc3   : > { %v367_v13 = vpop.permute.xlu0 %366  ;;  %v601_v43 = vsel %vm587_vm3, %v1381_v0, %v375_v6 }
  0xc4   : > { %v593_v2 = vsel %vm587_vm3, %v1384_v1, %v367_v13 }
  0xc6   : > { %v582_v11 = vpop.permute.xlu1 %581 }
  0xc7   : > { %v718_v48 = vsel %vm706_vm10, %v701_v18, %v582_v11  ;;  %v574_v56 = vpop.permute.xlu0 %573 }
  0xc8   : > { %1186 = vmatmul.mubr.msk.bf16.vlgmr.msra.gmra.mxu1 %vm750_vm11, %v718_v48  ;;  %v710_v60 = vsel %vm706_vm10, %v693_v50, %v574_v56  ;;  %v1728_v56 = vld [vmem:[%s1800_s2] ss:$0 sm:$0xff] }
  0xc9   : > { %1178 = vmatmul.mubr.msk.bf16.vlgmr.msra.gmra.mxu0 %vm750_vm11, %v710_v60 }
  0xca   : > { %v377_v4 = vpop.permute.xlu1 %376 }
  0xcb   : > { %v369_v16 = vpop.permute.xlu0 %368  ;;  %v603_v49 = vsel %vm587_vm3, %v1427_v31, %v377_v4 }
  0xcc   : > { %v595_v57 = vsel %vm587_vm3, %v1437_v41, %v369_v16 }
  0xce   : > { %v412_v19 = vpop.permute.xlu1 %411 }
  0xcf   : > { %v404_v20 = vpop.permute.xlu0 %403  ;;  %v618_v45 = vsel %vm604_vm4, %v601_v43, %v412_v19 }
  0xd0   : > { %v610_v47 = vsel %vm604_vm4, %v593_v2, %v404_v20 }
  0xd2   : > { %v414_v21 = vpop.permute.xlu1 %413 }
  0xd3   : > { %v406_v22 = vpop.permute.xlu0 %405  ;;  %v620_v54 = vsel %vm604_vm4, %v603_v49, %v414_v21 }
  0xd4   : > { %v612_v62 = vsel %vm604_vm4, %v595_v57, %v406_v22 }
  0xd6   : > { %v438_v24 = vpop.permute.xlu1 %437 }
  0xd7   : > { %v430_v25 = vpop.permute.xlu0 %429  ;;  %v635_v46 = vsel %vm621_vm6, %v618_v45, %v438_v24 }
  0xd8   : > { %v627_v52 = vsel %vm621_vm6, %v610_v47, %v430_v25 }
  0xda   : > { %v440_v26 = vpop.permute.xlu1 %439 }
  0xdb   : > { %v432_v27 = vpop.permute.xlu0 %431  ;;  %v637_v58 = vsel %vm621_vm6, %v620_v54, %v440_v26 }
  0xdc   : > { %v629_v6 = vsel %vm621_vm6, %v612_v62, %v432_v27 }
  0xde   : > { %v477_v28 = vpop.permute.xlu1 %476 }
  0xdf   : > { %v469_v29 = vpop.permute.xlu0 %468  ;;  %v652_v51 = vsel %vm638_vm5, %v635_v46, %v477_v28 }
  0xe0   : > { %v644_v55 = vsel %vm638_vm5, %v627_v52, %v469_v29 }
  0xe2   : > { %v479_v30 = vpop.permute.xlu1 %478 }
  0xe3   : > { %v471_v32 = vpop.permute.xlu0 %470  ;;  %v654_v63 = vsel %vm638_vm5, %v637_v58, %v479_v30 }
  0xe4   : > { %v646_v8 = vsel %vm638_vm5, %v629_v6, %v471_v32 }
  0xe6   : > { %v498_v33 = vpop.permute.xlu1 %497 }
  0xe7   : > { %v490_v34 = vpop.permute.xlu0 %489  ;;  %v669_v0 = vsel %vm655_vm7, %v652_v51, %v498_v33 }
  0xe8   : > { %v661_v59 = vsel %vm655_vm7, %v644_v55, %v490_v34 }
  0xea   : > { %v500_v35 = vpop.permute.xlu1 %499 }
  0xeb   : > { %v492_v36 = vpop.permute.xlu0 %491  ;;  %v671_v9 = vsel %vm655_vm7, %v654_v63, %v500_v35 }
  0xec   : > { %v663_v14 = vsel %vm655_vm7, %v646_v8, %v492_v36 }
  0xee   : > { %v524_v37 = vpop.permute.xlu1 %523 }
  0xef   : > { %v516_v38 = vpop.permute.xlu0 %515  ;;  %v686_v1 = vsel %vm672_vm8, %v669_v0, %v524_v37 }
  0xf0   : > { %v678_v3 = vsel %vm672_vm8, %v661_v59, %v516_v38 }
  0xf2   : > { %v526_v39 = vpop.permute.xlu1 %525 }
  0xf3   : > { %v518_v40 = vpop.permute.xlu0 %517  ;;  %v688_v12 = vsel %vm672_vm8, %v671_v9, %v526_v39 }
  0xf4   : > { %v680_v18 = vsel %vm672_vm8, %v663_v14, %v518_v40 }
  0xf6   : > { %v563_v42 = vpop.permute.xlu1 %562 }
  0xf7   : > { %v555_v44 = vpop.permute.xlu0 %554  ;;  %v703_v31 = vsel %vm689_vm9, %v686_v1, %v563_v42 }
  0xf8   : > { %v695_v41 = vsel %vm689_vm9, %v678_v3, %v555_v44 }
  0xfa   : > { %v565_v7 = vpop.permute.xlu1 %564 }
  0xfb   : > { %v557_v53 = vpop.permute.xlu0 %556  ;;  %v705_v15 = vsel %vm689_vm9, %v688_v12, %v565_v7 }
  0xfc   : > { %v697_v23 = vsel %vm689_vm9, %v680_v18, %v557_v53 }
  0xfe   : > { %v584_v61 = vpop.permute.xlu1 %583 }
  0xff   : > { %v720_v5 = vsel %vm706_vm10, %v703_v31, %v584_v61  ;;  %v576_v10 = vpop.permute.xlu0 %575 }
 0x100   : > { %1189 = vmatprep.mubr.msk.bf16.mxu1 %vm750_vm11, %v720_v5  ;;  %v712_v13 = vsel %vm706_vm10, %v695_v41, %v576_v10 }
 0x101   : > { %1181 = vmatprep.mubr.msk.bf16.mxu0 %vm750_vm11, %v712_v13 }
 0x102   : > { %v586_v17 = vpop.permute.xlu1 %585 }
 0x103   : > { %v722_v11 = vsel %vm706_vm10, %v705_v15, %v586_v17  ;;  %v578_v48 = vpop.permute.xlu0 %577 }
 0x104   : > { %1190 = vmatmul.mubr.msk.bf16.gmra.mxu1 %vm750_vm11, %v722_v11  ;;  %v714_v50 = vsel %vm706_vm10, %v697_v23, %v578_v48 }
 0x105   : > { %1182 = vmatmul.mubr.msk.bf16.gmra.mxu0 %vm750_vm11, %v714_v50 }
 0x188   : > { %v1187_v60 = vpop.f32.mrf.mxu1 }
 0x189   : > { %v846_v4 = vadd.f32 %v1187_v60, %v1728_v56  ;;  %v1179_v16 = vpop.f32.mrf.mxu0 }
 0x18a   : > { %v837_v19 = vpop.f32.mrf.mxu1  ;;  %v814_v20 = vadd.f32 %v1179_v16, %v1728_v56 }
 0x18b   : > { %vm878_vm12 = vcmp.ge.f32.partialorder %v846_v4, 0.0  ;;  %v894_v21 = vmul.f32 0.2, %v846_v4  ;;  %v838_v22 = vadd.f32 %v1728_v56, %v837_v19  ;;  %v805_v24 = vpop.f32.mrf.mxu0 }
 0x18c   : > { %v1188_v25 = vpop.f32.mrf.mxu1  ;;  %vm870_vm14 = vcmp.ge.f32.partialorder %v814_v20, 0.0  ;;  %v886_v26 = vmul.f32 0.2, %v814_v20  ;;  %v806_v28 = vadd.f32 %v1728_v56, %v805_v24 }
 0x18d   : > { %v910_v27 = vsel %vm878_vm12, %v846_v4, %v894_v21  ;;  %vm876_vm15 = vcmp.ge.f32.partialorder %v838_v22, 0.0  ;;  %v892_v30 = vmul.f32 0.2, %v838_v22  ;;  %v1180_v32 = vpop.f32.mrf.mxu0  ;;  %v849_v33 = vadd.f32 %v1188_v25, %v1728_v56 }
 0x18e   : > { %v1154_v29 = vpack.c.bf16 %v910_v27, %v910_v27  ;;  %v902_v34 = vsel %vm870_vm14, %v814_v20, %v886_v26  ;;  %vm868_vm0 = vcmp.ge.f32.partialorder %v806_v28, 0.0  ;;  %v884_v35 = vmul.f32 0.2, %v806_v28  ;;  %v840_v37 = vpop.f32.mrf.mxu1 }
 0x18f   : > { %v817_v36 = vadd.f32 %v1180_v32, %v1728_v56  ;;  %v1146_v38 = vpack.c.bf16 %v902_v34, %v902_v34  ;;  %v908_v39 = vsel %vm876_vm15, %v838_v22, %v892_v30  ;;  %vm879_vm1 = vcmp.ge.f32.partialorder %v849_v33, 0.0  ;;  %v808_v42 = vpop.f32.mrf.mxu0 }
 0x190   : > { %991 = vst.msk [vmem:[%s1736_s25 + $0x28] sm:$0xf] %vm980_vm13, %v1154_v29  ;;  %v895_v40 = vmul.f32 0.2, %v849_v33  ;;  %v900_v43 = vsel %vm868_vm0, %v806_v28, %v884_v35  ;;  %v1152_v44 = vpack.c.bf16 %v908_v39, %v908_v39  ;;  %v809_v7 = vadd.f32 %v1728_v56, %v808_v42 }
 0x191   : > { %vm871_vm2 = vcmp.ge.f32.partialorder %v817_v36, 0.0  ;;  %v887_v45 = vmul.f32 0.2, %v817_v36  ;;  %983 = vst.msk [vmem:[%s1736_s25 + $0x8] sm:$0xf] %vm980_vm13, %v1146_v38  ;;  %v1144_v2 = vpack.c.bf16 %v900_v43, %v900_v43  ;;  %v841_v47 = vadd.f32 %v1728_v56, %v840_v37 }
 0x192   : > { %v911_v46 = vsel %vm879_vm1, %v849_v33, %v895_v40  ;;  %989 = vst.msk [vmem:[%s1736_s25 + $0x20] sm:$0xf] %vm980_vm13, %v1152_v44  ;;  %vm869_vm3 = vcmp.ge.f32.partialorder %v809_v7, 0.0  ;;  %v885_v0 = vmul.f32 0.2, %v809_v7 }
 0x193   : > { %v903_v51 = vsel %vm871_vm2, %v817_v36, %v887_v45  ;;  %v1155_v49 = vpack.c.bf16 %v911_v46, %v911_v46  ;;  %981 = vst.msk [vmem:[%s1736_s25] sm:$0xf] %vm980_vm13, %v1144_v2  ;;  %vm877_vm4 = vcmp.ge.f32.partialorder %v841_v47, 0.0  ;;  %v893_v53 = vmul.f32 0.2, %v841_v47 }
 0x194   : > { %v1147_v52 = vpack.c.bf16 %v903_v51, %v903_v51  ;;  %v901_v54 = vsel %vm869_vm3, %v809_v7, %v885_v0 }
 0x195   : > { %992 = vst.msk [vmem:[%s1736_s25 + $0x2c] sm:$0xf] %vm980_vm13, %v1155_v49  ;;  %v1145_v55 = vpack.c.bf16 %v901_v54, %v901_v54  ;;  %v909_v1 = vsel %vm877_vm4, %v841_v47, %v893_v53 }
 0x196   : > { %984 = vst.msk [vmem:[%s1736_s25 + $0xc] sm:$0xf] %vm980_vm13, %v1147_v52  ;;  %v1153_v57 = vpack.c.bf16 %v909_v1, %v909_v1 }
 0x197   : > { %982 = vst.msk [vmem:[%s1736_s25 + $0x4] sm:$0xf] %vm980_vm13, %v1145_v55 }
 0x198   : > { %990 = vst.msk [vmem:[%s1736_s25 + $0x24] sm:$0xf] %vm980_vm13, %v1153_v57 }
 0x1c4   : > { %v1191_v58 = vpop.f32.mrf.mxu1 }
 0x1c5   : > { %v862_v59 = vadd.f32 %v1191_v58, %v1728_v56  ;;  %v1183_v31 = vpop.f32.mrf.mxu0 }
 0x1c6   : > { %v853_v61 = vpop.f32.mrf.mxu1  ;;  %v830_v62 = vadd.f32 %v1183_v31, %v1728_v56 }
 0x1c7   : > { %vm882_vm5 = vcmp.ge.f32.partialorder %v862_v59, 0.0  ;;  %v898_v63 = vmul.f32 0.2, %v862_v59  ;;  %v854_v3 = vadd.f32 %v1728_v56, %v853_v61  ;;  %v821_v5 = vpop.f32.mrf.mxu0 }
 0x1c8   : > { %v1192_v6 = vpop.f32.mrf.mxu1  ;;  %vm874_vm6 = vcmp.ge.f32.partialorder %v830_v62, 0.0  ;;  %v890_v9 = vmul.f32 0.2, %v830_v62  ;;  %v822_v10 = vadd.f32 %v1728_v56, %v821_v5 }
 0x1c9   : > { %v914_v41 = vsel %vm882_vm5, %v862_v59, %v898_v63  ;;  %vm880_vm7 = vcmp.ge.f32.partialorder %v854_v3, 0.0  ;;  %v896_v12 = vmul.f32 0.2, %v854_v3  ;;  %v1184_v13 = vpop.f32.mrf.mxu0  ;;  %v865_v14 = vadd.f32 %v1192_v6, %v1728_v56 }
 0x1ca   : > { %v1158_v8 = vpack.c.bf16 %v914_v41, %v914_v41  ;;  %v906_v15 = vsel %vm874_vm6, %v830_v62, %v890_v9  ;;  %vm872_vm8 = vcmp.ge.f32.partialorder %v822_v10, 0.0  ;;  %v888_v17 = vmul.f32 0.2, %v822_v10  ;;  %v856_v11 = vpop.f32.mrf.mxu1 }
 0x1cb   : > { %v833_v18 = vadd.f32 %v1184_v13, %v1728_v56  ;;  %v1150_v23 = vpack.c.bf16 %v906_v15, %v906_v15  ;;  %v912_v48 = vsel %vm880_vm7, %v854_v3, %v896_v12  ;;  %vm883_vm9 = vcmp.ge.f32.partialorder %v865_v14, 0.0  ;;  %v824_v60 = vpop.f32.mrf.mxu0 }
 0x1cc   : > { %995 = vst.msk [vmem:[%s1736_s25 + $0x38] sm:$0xf] %vm980_vm13, %v1158_v8  ;;  %v899_v50 = vmul.f32 0.2, %v865_v14  ;;  %v904_v4 = vsel %vm872_vm8, %v822_v10, %v888_v17  ;;  %v1156_v16 = vpack.c.bf16 %v912_v48, %v912_v48  ;;  %v825_v22 = vadd.f32 %v1728_v56, %v824_v60 }
 0x1cd   : > { %vm875_vm10 = vcmp.ge.f32.partialorder %v833_v18, 0.0  ;;  %v891_v19 = vmul.f32 0.2, %v833_v18  ;;  %987 = vst.msk [vmem:[%s1736_s25 + $0x18] sm:$0xf] %vm980_vm13, %v1150_v23  ;;  %v1148_v20 = vpack.c.bf16 %v904_v4, %v904_v4  ;;  %v857_v24 = vadd.f32 %v1728_v56, %v856_v11 }
 0x1ce   : > { %v915_v21 = vsel %vm883_vm9, %v865_v14, %v899_v50  ;;  %993 = vst.msk [vmem:[%s1736_s25 + $0x30] sm:$0xf] %vm980_vm13, %v1156_v16  ;;  %vm873_vm11 = vcmp.ge.f32.partialorder %v825_v22, 0.0  ;;  %v889_v28 = vmul.f32 0.2, %v825_v22 }
 0x1cf   : > { %v907_v25 = vsel %vm875_vm10, %v833_v18, %v891_v19  ;;  %v1159_v26 = vpack.c.bf16 %v915_v21, %v915_v21  ;;  %985 = vst.msk [vmem:[%s1736_s25 + $0x10] sm:$0xf] %vm980_vm13, %v1148_v20  ;;  %vm881_vm12 = vcmp.ge.f32.partialorder %v857_v24, 0.0  ;;  %v897_v29 = vmul.f32 0.2, %v857_v24 }
 0x1d0   : > { %v1151_v27 = vpack.c.bf16 %v907_v25, %v907_v25  ;;  %v905_v30 = vsel %vm873_vm11, %v825_v22, %v889_v28 }
 0x1d1   : > { %996 = vst.msk [vmem:[%s1736_s25 + $0x3c] sm:$0xf] %vm980_vm13, %v1159_v26  ;;  %v1149_v32 = vpack.c.bf16 %v905_v30, %v905_v30  ;;  %v913_v56 = vsel %vm881_vm12, %v857_v24, %v897_v29 }
 0x1d2   : > { %988 = vst.msk [vmem:[%s1736_s25 + $0x1c] sm:$0xf] %vm980_vm13, %v1151_v27  ;;  %v1157_v33 = vpack.c.bf16 %v913_v56, %v913_v56 }
 0x1d3   : > { %986 = vst.msk [vmem:[%s1736_s25 + $0x14] sm:$0xf] %vm980_vm13, %v1149_v32 }
 0x1d4   : > { %994 = vst.msk [vmem:[%s1736_s25 + $0x34] sm:$0xf] %vm980_vm13, %v1157_v33 }
 0x1d5 PF: > { %s13_s16 = sadd.s32 1, %s1309_s16   ;;  %s1802_s12 = smov %s1301_s14 }
 0x1d6   : > { %p10_p7 = scmp.ge.s32.totalorder %s13_s16, 18   ;;  %s1803_s13 = smov %s1305_s15 }
 0x1d7   : > { %s1804_s14 = smov %s1807_s17  ;;  %s1805_s15 = smov %s1811_s18 }
 0x1d8   :  { %12 = sbr.rel (!%p10_p7) target bundleno = 3 (0x3), region = 63 }

</bundles_post_ra>
